<compile_context>
chip_gen: v7x
topology: tpu7x:2x2x1
jax: 0.10.0
libtpu: 0.0.40
codegen_flags: <defaults>
</compile_context>

<pallas_src>
import functools

import jax
import jax.numpy as jnp
import numpy as np
from jax.experimental import pallas as pl
from jax.experimental.pallas import tpu as pltpu

NEG_SLOPE = 0.1
BN_EPS = 1e-5


def _leaky(x):
    return jnp.where(x >= 0, x, NEG_SLOPE * x)


def residual_block_kernel(x_ref, masks_ref, w1c_ref, b1_ref, w2m_ref, b2s_ref,
                          out_ref, xcol_ref, ycol_ref, *, cout, width):
    """Fused residual block for one batch element.

    x_ref     : (1, Cin, P)      input, channels-first, spatial flattened (P = H*W)
    masks_ref : (9, P)           per-tap in-bounds masks (implements zero padding)
    w1c_ref   : (2*Cout, 9*Cin)  [conv1 * BN1.scale ; 1x1 shortcut * BNs.scale @ centre tap]
    b1_ref    : (Cout, 1)        BN1 shift
    w2m_ref   : (Cout, 9*Cout)   conv2 * BN2.scale
    b2s_ref   : (Cout, 1)        BN2.shift + BNs.shift (single fused add)
    out_ref   : (1, Cout, P)     lane-dense output block
    xcol_ref  : (9*Cin,  P)      VMEM scratch: im2col slab of x
    ycol_ref  : (9*Cout, P)      VMEM scratch: im2col slab of the mid activation
    """
    P = x_ref.shape[2]
    cin = x_ref.shape[1]

    def im2col_into(z, col_ref, c):
        # Rows t*c:(t+1)*c of col_ref hold z shifted by tap t=(kh,kw), zero-padded (pad=1).
        for kh in range(3):
            for kw in range(3):
                t = kh * 3 + kw
                s = (kh - 1) * width + (kw - 1)          # flat spatial shift of this tap
                if s == 0:                               # centre tap: no shift, no mask
                    col_ref[t * c:(t + 1) * c, :] = z
                else:
                    shifted = pltpu.roll(z, (-s) % P, axis=1)
                    col_ref[t * c:(t + 1) * c, :] = shifted * masks_ref[t:t + 1, :]

    x = x_ref[0]                                                     # (Cin, P)

    # ---- conv1 (3x3, pad 1) and the 1x1 shortcut share one matmul: K = 9*Cin, N = P ----
    im2col_into(x, xcol_ref, cin)
    y = jnp.dot(w1c_ref[...], xcol_ref[...],
                preferred_element_type=jnp.float32)                  # (2*Cout, P)
    y1 = _leaky(y[:cout, :] + b1_ref[...])                           # BN1 shift + LeakyReLU
    sc = y[cout:, :]                                                 # shortcut (scale folded)

    # ---- conv2 (3x3, pad 1): single matmul with K = 9*Cout ----
    im2col_into(y1, ycol_ref, cout)
    y2 = jnp.dot(w2m_ref[...], ycol_ref[...],
                 preferred_element_type=jnp.float32)                 # (Cout, P)

    out_ref[0] = _leaky(y2 + sc + b2s_ref[...])                      # fused shifts + LeakyReLU


def _fold_bn(gamma, beta, mean, var):
    scale = (gamma / jnp.sqrt(var + BN_EPS)).astype(jnp.float32)
    shift = (beta - mean * scale).astype(jnp.float32)
    return scale, shift


def _tap_masks(H, W):
    hh = jnp.arange(H)[:, None]
    ww = jnp.arange(W)[None, :]
    rows = []
    for kh in range(3):
        for kw in range(3):
            dh, dw = kh - 1, kw - 1
            ok = (hh + dh >= 0) & (hh + dh < H) & (ww + dw >= 0) & (ww + dw < W)
            rows.append(ok.reshape(-1))
    return jnp.stack(rows, axis=0).astype(jnp.float32)               # (9, H*W)


def residual_block_2d(x_nchw, w1, bn1, w2, bn2, ws, bns):
    """x_nchw: (N, Cin, H, W); conv weights in PyTorch OIHW layout.  Returns (N, Cout, H, W)."""
    N, Cin, H, W = x_nchw.shape
    Cout = w1.shape[0]
    P = H * W

    s1, b1 = _fold_bn(*bn1)
    s2, b2 = _fold_bn(*bn2)
    ss, bs = _fold_bn(*bns)

    # conv1 weights with BN1 scale folded in; columns ordered (kh, kw, cin) to match im2col rows.
    w1_mat = jnp.transpose(w1, (0, 2, 3, 1)).reshape(Cout, 9 * Cin).astype(jnp.float32) * s1[:, None]
    # 1x1 shortcut with BNs scale folded in; occupies only the centre-tap (t == 4) columns.
    ws_mat = ws[:, :, 0, 0].astype(jnp.float32) * ss[:, None]
    w_sc = jnp.zeros((Cout, 9 * Cin), jnp.float32).at[:, 4 * Cin:5 * Cin].set(ws_mat)
    w1c = jnp.concatenate([w1_mat, w_sc], axis=0)                    # (2*Cout, 9*Cin)

    w2m = jnp.transpose(w2, (0, 2, 3, 1)).reshape(Cout, 9 * Cout).astype(jnp.float32) * s2[:, None]

    b1c = b1.reshape(Cout, 1)
    b2s = (b2 + bs).reshape(Cout, 1)                                 # BN2 + BN_shortcut shifts

    masks = _tap_masks(H, W)
    x2d = x_nchw.reshape(N, Cin, P).astype(jnp.float32)              # no padded/im2col HBM array

    kernel = functools.partial(residual_block_kernel, cout=Cout, width=W)

    out = pl.pallas_call(
        kernel,
        out_shape=jax.ShapeDtypeStruct((N, Cout, P), jnp.float32),
        grid_spec=pltpu.PrefetchScalarGridSpec(
            num_scalar_prefetch=0,
            grid=(N,),
            in_specs=[
                pl.BlockSpec((1, Cin, P), lambda n: (n, 0, 0)),
                pl.BlockSpec((9, P), lambda n: (0, 0)),
                pl.BlockSpec((2 * Cout, 9 * Cin), lambda n: (0, 0)),
                pl.BlockSpec((Cout, 1), lambda n: (0, 0)),
                pl.BlockSpec((Cout, 9 * Cout), lambda n: (0, 0)),
                pl.BlockSpec((Cout, 1), lambda n: (0, 0)),
            ],
            out_specs=pl.BlockSpec((1, Cout, P), lambda n: (n, 0, 0)),
            scratch_shapes=[
                pltpu.VMEM((9 * Cin, P), jnp.float32),
                pltpu.VMEM((9 * Cout, P), jnp.float32),
            ],
        ),
        compiler_params=pltpu.CompilerParams(dimension_semantics=("parallel",)),
    )(x2d, masks, w1c, b1c, w2m, b2s)

    return out.reshape(N, Cout, H, W)


# ---------------- pure-JAX reference (matches PyTorch eval-mode forward) ----------------
def _ref_forward(x, w1, bn1, w2, bn2, ws, bns):
    def bn(y, p):
        g, b, m, v = p
        inv = g / jnp.sqrt(v + BN_EPS)
        return (y - m[None, :, None, None]) * inv[None, :, None, None] + b[None, :, None, None]

    def conv(y, w, pad):
        return jax.lax.conv_general_dilated(
            y, w, window_strides=(1, 1), padding=[(pad, pad), (pad, pad)],
            dimension_numbers=("NCHW", "OIHW", "NCHW"))

    def lrelu(y):
        return jnp.where(y >= 0, y, NEG_SLOPE * y)

    y = lrelu(bn(conv(x, w1, 1), bn1))
    y = bn(conv(y, w2, 1), bn2)
    s = bn(conv(x, ws, 0), bns)
    return lrelu(y + s)


if __name__ == "__main__":
    N, Cin, Cout, H, W = 2, 4, 8, 16, 16

    key = jax.random.PRNGKey(0)
    keys = jax.random.split(key, 8)

    x = jax.random.normal(keys[0], (N, Cin, H, W), dtype=jnp.float32)
    w1 = 0.2 * jax.random.normal(keys[1], (Cout, Cin, 3, 3), dtype=jnp.float32)
    w2 = 0.2 * jax.random.normal(keys[2], (Cout, Cout, 3, 3), dtype=jnp.float32)
    ws = 0.2 * jax.random.normal(keys[3], (Cout, Cin, 1, 1), dtype=jnp.float32)

    def make_bn(k):
        ka, kb, kc, kd = jax.random.split(k, 4)
        gamma = 0.5 + jax.random.uniform(ka, (Cout,), dtype=jnp.float32)
        beta = 0.1 * jax.random.normal(kb, (Cout,), dtype=jnp.float32)
        mean = 0.1 * jax.random.normal(kc, (Cout,), dtype=jnp.float32)
        var = 0.5 + jax.random.uniform(kd, (Cout,), dtype=jnp.float32)
        return (gamma, beta, mean, var)

    bn1, bn2, bns = make_bn(keys[4]), make_bn(keys[5]), make_bn(keys[6])

    out = residual_block_2d(x, w1, bn1, w2, bn2, ws, bns)
    out = jax.block_until_ready(out)

    ref = _ref_forward(x, w1, bn1, w2, bn2, ws, bns)
    np.testing.assert_allclose(np.asarray(out), np.asarray(ref), rtol=1e-4, atol=1e-4)

    print("KERNEL_OK")
</pallas_src>

<mosaic_0001>
module attributes {stable_mosaic.version = 11 : i64} {
  func.func @residual_block_kernel(%arg0: i32, %arg1: memref<1x4x256xf32, #tpu.memory_space<vmem>>, %arg2: memref<9x256xf32, #tpu.memory_space<vmem>>, %arg3: memref<16x36xf32, #tpu.memory_space<vmem>>, %arg4: memref<8x1xf32, #tpu.memory_space<vmem>>, %arg5: memref<8x72xf32, #tpu.memory_space<vmem>>, %arg6: memref<8x1xf32, #tpu.memory_space<vmem>>, %arg7: memref<1x8x256xf32, #tpu.memory_space<vmem>>, %arg8: memref<36x256xf32, #tpu.memory_space<vmem>>, %arg9: memref<72x256xf32, #tpu.memory_space<vmem>>) attributes {dimension_semantics = [#tpu.dimension_semantics<parallel>], iteration_bounds = array<i64: 2>, scalar_prefetch = 0 : i64, scratch_operands = 2 : i64, tpu.core_type = #tpu.core_type<tc>, window_params = [{transform_indices = @transform_0, window_bounds = array<i64: 1, 4, 256>}, {pipeline_mode = #tpu.pipeline_mode<synchronous>, transform_indices = @transform_1, window_bounds = array<i64: 9, 256>}, {pipeline_mode = #tpu.pipeline_mode<synchronous>, transform_indices = @transform_2, window_bounds = array<i64: 16, 36>}, {pipeline_mode = #tpu.pipeline_mode<synchronous>, transform_indices = @transform_3, window_bounds = array<i64: 8, 1>}, {pipeline_mode = #tpu.pipeline_mode<synchronous>, transform_indices = @transform_4, window_bounds = array<i64: 8, 72>}, {pipeline_mode = #tpu.pipeline_mode<synchronous>, transform_indices = @transform_5, window_bounds = array<i64: 8, 1>}, {transform_indices = @transform_6, window_bounds = array<i64: 1, 8, 256>}]} {
    %c0 = arith.constant 0 : index
    %c0_0 = arith.constant 0 : index
    %c0_1 = arith.constant 0 : index
    %0 = vector.load %arg1[%c0, %c0_0, %c0_1] : memref<1x4x256xf32, #tpu.memory_space<vmem>>, vector<1x4x256xf32>
    %1 = vector.shape_cast %0 : vector<1x4x256xf32> to vector<4x256xf32>
    %c17_i32 = arith.constant 17 : i32
    %2 = tpu.dynamic_rotate %1 by %c17_i32 dim 1 : vector<4x256xf32>, i32 -> vector<4x256xf32>
    %c0_2 = arith.constant 0 : index
    %c0_3 = arith.constant 0 : index
    %3 = vector.load %arg2[%c0_2, %c0_3] : memref<9x256xf32, #tpu.memory_space<vmem>>, vector<1x256xf32>
    %4 = vector.broadcast %3 : vector<1x256xf32> to vector<4x256xf32>
    %5 = arith.mulf %2, %4 : vector<4x256xf32>
    %c0_4 = arith.constant 0 : index
    %c0_5 = arith.constant 0 : index
    %6 = vector.load %arg8[%c0_4, %c0_5] : memref<36x256xf32, #tpu.memory_space<vmem>>, vector<4x256xf32>
    tpu.vector_store %arg8[%c0_4, %c0_5], %5 {strides = array<i32>} : memref<36x256xf32, #tpu.memory_space<vmem>>, vector<4x256xf32>,
    %c16_i32 = arith.constant 16 : i32
    %7 = tpu.dynamic_rotate %1 by %c16_i32 dim 1 : vector<4x256xf32>, i32 -> vector<4x256xf32>
    %c1 = arith.constant 1 : index
    %c0_6 = arith.constant 0 : index
    %8 = vector.load %arg2[%c1, %c0_6] : memref<9x256xf32, #tpu.memory_space<vmem>>, vector<1x256xf32>
    %9 = vector.broadcast %8 : vector<1x256xf32> to vector<4x256xf32>
    %10 = arith.mulf %7, %9 : vector<4x256xf32>
    %c4 = arith.constant 4 : index
    %c0_7 = arith.constant 0 : index
    %11 = vector.load %arg8[%c4, %c0_7] : memref<36x256xf32, #tpu.memory_space<vmem>>, vector<4x256xf32>
    tpu.vector_store %arg8[%c4, %c0_7], %10 {strides = array<i32>} : memref<36x256xf32, #tpu.memory_space<vmem>>, vector<4x256xf32>,
    %c15_i32 = arith.constant 15 : i32
    %12 = tpu.dynamic_rotate %1 by %c15_i32 dim 1 : vector<4x256xf32>, i32 -> vector<4x256xf32>
    %c2 = arith.constant 2 : index
    %c0_8 = arith.constant 0 : index
    %13 = vector.load %arg2[%c2, %c0_8] : memref<9x256xf32, #tpu.memory_space<vmem>>, vector<1x256xf32>
    %14 = vector.broadcast %13 : vector<1x256xf32> to vector<4x256xf32>
    %15 = arith.mulf %12, %14 : vector<4x256xf32>
    %c8 = arith.constant 8 : index
    %c0_9 = arith.constant 0 : index
    %16 = vector.load %arg8[%c8, %c0_9] : memref<36x256xf32, #tpu.memory_space<vmem>>, vector<4x256xf32>
    tpu.vector_store %arg8[%c8, %c0_9], %15 {strides = array<i32>} : memref<36x256xf32, #tpu.memory_space<vmem>>, vector<4x256xf32>,
    %c1_i32 = arith.constant 1 : i32
    %17 = tpu.dynamic_rotate %1 by %c1_i32 dim 1 : vector<4x256xf32>, i32 -> vector<4x256xf32>
    %c3 = arith.constant 3 : index
    %c0_10 = arith.constant 0 : index
    %18 = vector.load %arg2[%c3, %c0_10] : memref<9x256xf32, #tpu.memory_space<vmem>>, vector<1x256xf32>
    %19 = vector.broadcast %18 : vector<1x256xf32> to vector<4x256xf32>
    %20 = arith.mulf %17, %19 : vector<4x256xf32>
    %c12 = arith.constant 12 : index
    %c0_11 = arith.constant 0 : index
    %21 = vector.load %arg8[%c12, %c0_11] : memref<36x256xf32, #tpu.memory_space<vmem>>, vector<4x256xf32>
    tpu.vector_store %arg8[%c12, %c0_11], %20 {strides = array<i32>} : memref<36x256xf32, #tpu.memory_space<vmem>>, vector<4x256xf32>,
    %c16 = arith.constant 16 : index
    %c0_12 = arith.constant 0 : index
    %22 = vector.load %arg8[%c16, %c0_12] : memref<36x256xf32, #tpu.memory_space<vmem>>, vector<4x256xf32>
    tpu.vector_store %arg8[%c16, %c0_12], %1 {strides = array<i32>} : memref<36x256xf32, #tpu.memory_space<vmem>>, vector<4x256xf32>,
    %c255_i32 = arith.constant 255 : i32
    %23 = tpu.dynamic_rotate %1 by %c255_i32 dim 1 : vector<4x256xf32>, i32 -> vector<4x256xf32>
    %c5 = arith.constant 5 : index
    %c0_13 = arith.constant 0 : index
    %24 = vector.load %arg2[%c5, %c0_13] : memref<9x256xf32, #tpu.memory_space<vmem>>, vector<1x256xf32>
    %25 = vector.broadcast %24 : vector<1x256xf32> to vector<4x256xf32>
    %26 = arith.mulf %23, %25 : vector<4x256xf32>
    %c20 = arith.constant 20 : index
    %c0_14 = arith.constant 0 : index
    %27 = vector.load %arg8[%c20, %c0_14] : memref<36x256xf32, #tpu.memory_space<vmem>>, vector<4x256xf32>
    tpu.vector_store %arg8[%c20, %c0_14], %26 {strides = array<i32>} : memref<36x256xf32, #tpu.memory_space<vmem>>, vector<4x256xf32>,
    %c241_i32 = arith.constant 241 : i32
    %28 = tpu.dynamic_rotate %1 by %c241_i32 dim 1 : vector<4x256xf32>, i32 -> vector<4x256xf32>
    %c6 = arith.constant 6 : index
    %c0_15 = arith.constant 0 : index
    %29 = vector.load %arg2[%c6, %c0_15] : memref<9x256xf32, #tpu.memory_space<vmem>>, vector<1x256xf32>
    %30 = vector.broadcast %29 : vector<1x256xf32> to vector<4x256xf32>
    %31 = arith.mulf %28, %30 : vector<4x256xf32>
    %c24 = arith.constant 24 : index
    %c0_16 = arith.constant 0 : index
    %32 = vector.load %arg8[%c24, %c0_16] : memref<36x256xf32, #tpu.memory_space<vmem>>, vector<4x256xf32>
    tpu.vector_store %arg8[%c24, %c0_16], %31 {strides = array<i32>} : memref<36x256xf32, #tpu.memory_space<vmem>>, vector<4x256xf32>,
    %c240_i32 = arith.constant 240 : i32
    %33 = tpu.dynamic_rotate %1 by %c240_i32 dim 1 : vector<4x256xf32>, i32 -> vector<4x256xf32>
    %c7 = arith.constant 7 : index
    %c0_17 = arith.constant 0 : index
    %34 = vector.load %arg2[%c7, %c0_17] : memref<9x256xf32, #tpu.memory_space<vmem>>, vector<1x256xf32>
    %35 = vector.broadcast %34 : vector<1x256xf32> to vector<4x256xf32>
    %36 = arith.mulf %33, %35 : vector<4x256xf32>
    %c28 = arith.constant 28 : index
    %c0_18 = arith.constant 0 : index
    %37 = vector.load %arg8[%c28, %c0_18] : memref<36x256xf32, #tpu.memory_space<vmem>>, vector<4x256xf32>
    tpu.vector_store %arg8[%c28, %c0_18], %36 {strides = array<i32>} : memref<36x256xf32, #tpu.memory_space<vmem>>, vector<4x256xf32>,
    %c239_i32 = arith.constant 239 : i32
    %38 = tpu.dynamic_rotate %1 by %c239_i32 dim 1 : vector<4x256xf32>, i32 -> vector<4x256xf32>
    %c8_19 = arith.constant 8 : index
    %c0_20 = arith.constant 0 : index
    %39 = vector.load %arg2[%c8_19, %c0_20] : memref<9x256xf32, #tpu.memory_space<vmem>>, vector<1x256xf32>
    %40 = vector.broadcast %39 : vector<1x256xf32> to vector<4x256xf32>
    %41 = arith.mulf %38, %40 : vector<4x256xf32>
    %c32 = arith.constant 32 : index
    %c0_21 = arith.constant 0 : index
    %42 = vector.load %arg8[%c32, %c0_21] : memref<36x256xf32, #tpu.memory_space<vmem>>, vector<4x256xf32>
    tpu.vector_store %arg8[%c32, %c0_21], %41 {strides = array<i32>} : memref<36x256xf32, #tpu.memory_space<vmem>>, vector<4x256xf32>,
    %c0_22 = arith.constant 0 : index
    %c0_23 = arith.constant 0 : index
    %43 = vector.load %arg3[%c0_22, %c0_23] : memref<16x36xf32, #tpu.memory_space<vmem>>, vector<16x36xf32>
    %c0_24 = arith.constant 0 : index
    %c0_25 = arith.constant 0 : index
    %44 = vector.load %arg8[%c0_24, %c0_25] : memref<36x256xf32, #tpu.memory_space<vmem>>, vector<36x256xf32>
    %cst = arith.constant dense<0.000000e+00> : vector<16x256xf32>
    %45 = tpu.matmul %43, %44, %cst {dimension_numbers = #tpu.dot_dimension_numbers<[1], [0], [0], [1], [0, 0, 1, 1], [], []>} : vector<16x36xf32>, vector<36x256xf32>, vector<16x256xf32> -> vector<16x256xf32>
    %46 = vector.extract_strided_slice %45 {offsets = [0, 0], sizes = [8, 256], strides = [1, 1]} : vector<16x256xf32> to vector<8x256xf32>
    %c0_26 = arith.constant 0 : index
    %c0_27 = arith.constant 0 : index
    %47 = vector.load %arg4[%c0_26, %c0_27] : memref<8x1xf32, #tpu.memory_space<vmem>>, vector<8x1xf32>
    %48 = vector.broadcast %47 : vector<8x1xf32> to vector<8x256xf32>
    %49 = arith.addf %46, %48 : vector<8x256xf32>
    %cst_28 = arith.constant 0.000000e+00 : f32
    %50 = vector.broadcast %cst_28 : f32 to vector<8x256xf32>
    %51 = arith.cmpf oge, %49, %50 : vector<8x256xf32>
    %cst_29 = arith.constant 1.000000e-01 : f32
    %52 = vector.broadcast %cst_29 : f32 to vector<8x256xf32>
    %53 = arith.mulf %52, %49 : vector<8x256xf32>
    %54 = arith.select %51, %49, %53 : vector<8x256xi1>, vector<8x256xf32>
    %55 = vector.extract_strided_slice %45 {offsets = [8, 0], sizes = [8, 256], strides = [1, 1]} : vector<16x256xf32> to vector<8x256xf32>
    %c17_i32_30 = arith.constant 17 : i32
    %56 = tpu.dynamic_rotate %54 by %c17_i32_30 dim 1 : vector<8x256xf32>, i32 -> vector<8x256xf32>
    %c0_31 = arith.constant 0 : index
    %c0_32 = arith.constant 0 : index
    %57 = vector.load %arg2[%c0_31, %c0_32] : memref<9x256xf32, #tpu.memory_space<vmem>>, vector<1x256xf32>
    %58 = vector.broadcast %57 : vector<1x256xf32> to vector<8x256xf32>
    %59 = arith.mulf %56, %58 : vector<8x256xf32>
    %c0_33 = arith.constant 0 : index
    %c0_34 = arith.constant 0 : index
    %60 = vector.load %arg9[%c0_33, %c0_34] : memref<72x256xf32, #tpu.memory_space<vmem>>, vector<8x256xf32>
    tpu.vector_store %arg9[%c0_33, %c0_34], %59 {strides = array<i32>} : memref<72x256xf32, #tpu.memory_space<vmem>>, vector<8x256xf32>,
    %c16_i32_35 = arith.constant 16 : i32
    %61 = tpu.dynamic_rotate %54 by %c16_i32_35 dim 1 : vector<8x256xf32>, i32 -> vector<8x256xf32>
    %c1_36 = arith.constant 1 : index
    %c0_37 = arith.constant 0 : index
    %62 = vector.load %arg2[%c1_36, %c0_37] : memref<9x256xf32, #tpu.memory_space<vmem>>, vector<1x256xf32>
    %63 = vector.broadcast %62 : vector<1x256xf32> to vector<8x256xf32>
    %64 = arith.mulf %61, %63 : vector<8x256xf32>
    %c8_38 = arith.constant 8 : index
    %c0_39 = arith.constant 0 : index
    %65 = vector.load %arg9[%c8_38, %c0_39] : memref<72x256xf32, #tpu.memory_space<vmem>>, vector<8x256xf32>
    tpu.vector_store %arg9[%c8_38, %c0_39], %64 {strides = array<i32>} : memref<72x256xf32, #tpu.memory_space<vmem>>, vector<8x256xf32>,
    %c15_i32_40 = arith.constant 15 : i32
    %66 = tpu.dynamic_rotate %54 by %c15_i32_40 dim 1 : vector<8x256xf32>, i32 -> vector<8x256xf32>
    %c2_41 = arith.constant 2 : index
    %c0_42 = arith.constant 0 : index
    %67 = vector.load %arg2[%c2_41, %c0_42] : memref<9x256xf32, #tpu.memory_space<vmem>>, vector<1x256xf32>
    %68 = vector.broadcast %67 : vector<1x256xf32> to vector<8x256xf32>
    %69 = arith.mulf %66, %68 : vector<8x256xf32>
    %c16_43 = arith.constant 16 : index
    %c0_44 = arith.constant 0 : index
    %70 = vector.load %arg9[%c16_43, %c0_44] : memref<72x256xf32, #tpu.memory_space<vmem>>, vector<8x256xf32>
    tpu.vector_store %arg9[%c16_43, %c0_44], %69 {strides = array<i32>} : memref<72x256xf32, #tpu.memory_space<vmem>>, vector<8x256xf32>,
    %c1_i32_45 = arith.constant 1 : i32
    %71 = tpu.dynamic_rotate %54 by %c1_i32_45 dim 1 : vector<8x256xf32>, i32 -> vector<8x256xf32>
    %c3_46 = arith.constant 3 : index
    %c0_47 = arith.constant 0 : index
    %72 = vector.load %arg2[%c3_46, %c0_47] : memref<9x256xf32, #tpu.memory_space<vmem>>, vector<1x256xf32>
    %73 = vector.broadcast %72 : vector<1x256xf32> to vector<8x256xf32>
    %74 = arith.mulf %71, %73 : vector<8x256xf32>
    %c24_48 = arith.constant 24 : index
    %c0_49 = arith.constant 0 : index
    %75 = vector.load %arg9[%c24_48, %c0_49] : memref<72x256xf32, #tpu.memory_space<vmem>>, vector<8x256xf32>
    tpu.vector_store %arg9[%c24_48, %c0_49], %74 {strides = array<i32>} : memref<72x256xf32, #tpu.memory_space<vmem>>, vector<8x256xf32>,
    %c32_50 = arith.constant 32 : index
    %c0_51 = arith.constant 0 : index
    %76 = vector.load %arg9[%c32_50, %c0_51] : memref<72x256xf32, #tpu.memory_space<vmem>>, vector<8x256xf32>
    tpu.vector_store %arg9[%c32_50, %c0_51], %54 {strides = array<i32>} : memref<72x256xf32, #tpu.memory_space<vmem>>, vector<8x256xf32>,
    %c255_i32_52 = arith.constant 255 : i32
    %77 = tpu.dynamic_rotate %54 by %c255_i32_52 dim 1 : vector<8x256xf32>, i32 -> vector<8x256xf32>
    %c5_53 = arith.constant 5 : index
    %c0_54 = arith.constant 0 : index
    %78 = vector.load %arg2[%c5_53, %c0_54] : memref<9x256xf32, #tpu.memory_space<vmem>>, vector<1x256xf32>
    %79 = vector.broadcast %78 : vector<1x256xf32> to vector<8x256xf32>
    %80 = arith.mulf %77, %79 : vector<8x256xf32>
    %c40 = arith.constant 40 : index
    %c0_55 = arith.constant 0 : index
    %81 = vector.load %arg9[%c40, %c0_55] : memref<72x256xf32, #tpu.memory_space<vmem>>, vector<8x256xf32>
    tpu.vector_store %arg9[%c40, %c0_55], %80 {strides = array<i32>} : memref<72x256xf32, #tpu.memory_space<vmem>>, vector<8x256xf32>,
    %c241_i32_56 = arith.constant 241 : i32
    %82 = tpu.dynamic_rotate %54 by %c241_i32_56 dim 1 : vector<8x256xf32>, i32 -> vector<8x256xf32>
    %c6_57 = arith.constant 6 : index
    %c0_58 = arith.constant 0 : index
    %83 = vector.load %arg2[%c6_57, %c0_58] : memref<9x256xf32, #tpu.memory_space<vmem>>, vector<1x256xf32>
    %84 = vector.broadcast %83 : vector<1x256xf32> to vector<8x256xf32>
    %85 = arith.mulf %82, %84 : vector<8x256xf32>
    %c48 = arith.constant 48 : index
    %c0_59 = arith.constant 0 : index
    %86 = vector.load %arg9[%c48, %c0_59] : memref<72x256xf32, #tpu.memory_space<vmem>>, vector<8x256xf32>
    tpu.vector_store %arg9[%c48, %c0_59], %85 {strides = array<i32>} : memref<72x256xf32, #tpu.memory_space<vmem>>, vector<8x256xf32>,
    %c240_i32_60 = arith.constant 240 : i32
    %87 = tpu.dynamic_rotate %54 by %c240_i32_60 dim 1 : vector<8x256xf32>, i32 -> vector<8x256xf32>
    %c7_61 = arith.constant 7 : index
    %c0_62 = arith.constant 0 : index
    %88 = vector.load %arg2[%c7_61, %c0_62] : memref<9x256xf32, #tpu.memory_space<vmem>>, vector<1x256xf32>
    %89 = vector.broadcast %88 : vector<1x256xf32> to vector<8x256xf32>
    %90 = arith.mulf %87, %89 : vector<8x256xf32>
    %c56 = arith.constant 56 : index
    %c0_63 = arith.constant 0 : index
    %91 = vector.load %arg9[%c56, %c0_63] : memref<72x256xf32, #tpu.memory_space<vmem>>, vector<8x256xf32>
    tpu.vector_store %arg9[%c56, %c0_63], %90 {strides = array<i32>} : memref<72x256xf32, #tpu.memory_space<vmem>>, vector<8x256xf32>,
    %c239_i32_64 = arith.constant 239 : i32
    %92 = tpu.dynamic_rotate %54 by %c239_i32_64 dim 1 : vector<8x256xf32>, i32 -> vector<8x256xf32>
    %c8_65 = arith.constant 8 : index
    %c0_66 = arith.constant 0 : index
    %93 = vector.load %arg2[%c8_65, %c0_66] : memref<9x256xf32, #tpu.memory_space<vmem>>, vector<1x256xf32>
    %94 = vector.broadcast %93 : vector<1x256xf32> to vector<8x256xf32>
    %95 = arith.mulf %92, %94 : vector<8x256xf32>
    %c64 = arith.constant 64 : index
    %c0_67 = arith.constant 0 : index
    %96 = vector.load %arg9[%c64, %c0_67] : memref<72x256xf32, #tpu.memory_space<vmem>>, vector<8x256xf32>
    tpu.vector_store %arg9[%c64, %c0_67], %95 {strides = array<i32>} : memref<72x256xf32, #tpu.memory_space<vmem>>, vector<8x256xf32>,
    %c0_68 = arith.constant 0 : index
    %c0_69 = arith.constant 0 : index
    %97 = vector.load %arg5[%c0_68, %c0_69] : memref<8x72xf32, #tpu.memory_space<vmem>>, vector<8x72xf32>
    %c0_70 = arith.constant 0 : index
    %c0_71 = arith.constant 0 : index
    %98 = vector.load %arg9[%c0_70, %c0_71] : memref<72x256xf32, #tpu.memory_space<vmem>>, vector<72x256xf32>
    %cst_72 = arith.constant dense<0.000000e+00> : vector<8x256xf32>
    %99 = tpu.matmul %97, %98, %cst_72 {dimension_numbers = #tpu.dot_dimension_numbers<[1], [0], [0], [1], [0, 0, 1, 1], [], []>} : vector<8x72xf32>, vector<72x256xf32>, vector<8x256xf32> -> vector<8x256xf32>
    %100 = arith.addf %99, %55 : vector<8x256xf32>
    %c0_73 = arith.constant 0 : index
    %c0_74 = arith.constant 0 : index
    %101 = vector.load %arg6[%c0_73, %c0_74] : memref<8x1xf32, #tpu.memory_space<vmem>>, vector<8x1xf32>
    %102 = vector.broadcast %101 : vector<8x1xf32> to vector<8x256xf32>
    %103 = arith.addf %100, %102 : vector<8x256xf32>
    %cst_75 = arith.constant 0.000000e+00 : f32
    %104 = vector.broadcast %cst_75 : f32 to vector<8x256xf32>
    %105 = arith.cmpf oge, %103, %104 : vector<8x256xf32>
    %cst_76 = arith.constant 1.000000e-01 : f32
    %106 = vector.broadcast %cst_76 : f32 to vector<8x256xf32>
    %107 = arith.mulf %106, %103 : vector<8x256xf32>
    %108 = arith.select %105, %103, %107 : vector<8x256xi1>, vector<8x256xf32>
    %c0_77 = arith.constant 0 : index
    %c0_78 = arith.constant 0 : index
    %c0_79 = arith.constant 0 : index
    %109 = vector.load %arg7[%c0_77, %c0_78, %c0_79] : memref<1x8x256xf32, #tpu.memory_space<vmem>>, vector<1x8x256xf32>
    %110 = vector.shape_cast %109 : vector<1x8x256xf32> to vector<8x256xf32>
    %111 = vector.shape_cast %108 : vector<8x256xf32> to vector<1x8x256xf32>
    tpu.vector_store %arg7[%c0_77, %c0_78, %c0_79], %111 {strides = array<i32>} : memref<1x8x256xf32, #tpu.memory_space<vmem>>, vector<1x8x256xf32>,
    return
  }
  func.func @transform_0(%arg0: i32) -> (i32, i32, i32) {
    %c0_i32 = arith.constant 0 : i32
    %c0_i32_0 = arith.constant 0 : i32
    %c0_i32_1 = arith.constant 0 : i32
    return %arg0, %c0_i32, %c0_i32_0 : i32, i32, i32
  }
  func.func @transform_1(%arg0: i32) -> (i32, i32) {
    %c0_i32 = arith.constant 0 : i32
    %c0_i32_0 = arith.constant 0 : i32
    %c0_i32_1 = arith.constant 0 : i32
    return %c0_i32, %c0_i32_0 : i32, i32
  }
  func.func @transform_2(%arg0: i32) -> (i32, i32) {
    %c0_i32 = arith.constant 0 : i32
    %c0_i32_0 = arith.constant 0 : i32
    %c0_i32_1 = arith.constant 0 : i32
    return %c0_i32, %c0_i32_0 : i32, i32
  }
  func.func @transform_3(%arg0: i32) -> (i32, i32) {
    %c0_i32 = arith.constant 0 : i32
    %c0_i32_0 = arith.constant 0 : i32
    %c0_i32_1 = arith.constant 0 : i32
    return %c0_i32, %c0_i32_0 : i32, i32
  }
  func.func @transform_4(%arg0: i32) -> (i32, i32) {
    %c0_i32 = arith.constant 0 : i32
    %c0_i32_0 = arith.constant 0 : i32
    %c0_i32_1 = arith.constant 0 : i32
    return %c0_i32, %c0_i32_0 : i32, i32
  }
  func.func @transform_5(%arg0: i32) -> (i32, i32) {
    %c0_i32 = arith.constant 0 : i32
    %c0_i32_0 = arith.constant 0 : i32
    %c0_i32_1 = arith.constant 0 : i32
    return %c0_i32, %c0_i32_0 : i32, i32
  }
  func.func @transform_6(%arg0: i32) -> (i32, i32, i32) {
    %c0_i32 = arith.constant 0 : i32
    %c0_i32_0 = arith.constant 0 : i32
    %c0_i32_1 = arith.constant 0 : i32
    return %arg0, %c0_i32, %c0_i32_0 : i32, i32, i32
  }
}

</mosaic_0001>

<bundles_post_ra>
// kernel: tpu_custom_call.1
= control target key start
LH: loop header
LB: loop body
LE: loop exit
PB: predicated region body
PF: predicated region fallthrough
CT: control target
= control target key end

     0   :  { %11 = vsyncpa [#allocation5], 0  ;;  %s1659_s0 = inlined_call_operand.vmem [shape: f32[2,4,256], index: 0, kind: input, shape index: {}]   ;;  %s1660_s1 = inlined_call_operand.hbm [shape: f32[9,256], index: 1, kind: input, shape index: {}]   ;;  %s1661_s2 = inlined_call_operand.hbm [shape: f32[16,36], index: 2, kind: input, shape index: {}]   ;;  %s1662_s3 = inlined_call_operand.vmem [shape: f32[8,1], index: 3, kind: input, shape index: {}]   ;;  %s1663_s4 = inlined_call_operand.vmem [shape: f32[8,72], index: 4, kind: input, shape index: {}]   ;;  %s1664_s5 = inlined_call_operand.vmem [shape: f32[8,1], index: 5, kind: input, shape index: {}]   ;;  %s1665_s6 = inlined_call_operand.hbm [shape: f32[2,8,256], index: 6, kind: output, shape index: {}]  }
   0x1   :  { %12 = vsyncpa [#allocation8], 0 }
   0x2   :  { %13 = vsyncpa [#allocation6], 0 }
   0x3   :  { %15 = vsyncpa [#allocation6 + $0x1], 0  ;;  %s1309_s21 = smov 0   ;;  %s1311_s22 = smov 0  }
   0x4   :  { %s1313_s23 = smov 0   ;;  %s1315_s24 = smov 0  }
   0x5 LB: > { %s1330_s25 = sadd.s32 4294967295, %s1255_s24   ;;  %s1004_s26 = sadd.s32 4294967294, %s1255_s24   ;;  %s1255_s24 = sphi %s1315_s24, %s1683_s24   ;;  %s1251_s23 = sphi %s1313_s23, %s1682_s23   ;;  %s1247_s22 = sphi %s1311_s22, %s1681_s22   ;;  %s1243_s21 = sphi %s1309_s21, %s1680_s21  }
   0x6   : > { %s1334_s27 = sadd.s32 1, %s1255_s24   ;;  %s159_s28 = sadd.s32 1, %s1251_s23 }
   0x7   : > { %s156_s29 = ssub.s32 %s1255_s24, %s1334_s27  ;;  %p169_p0 = scmp.ne.s32.totalorder %s1251_s23, %s1247_s22 }
   0x8   : > { %p157_p1 = scmp.eq.s32.totalorder %s156_s29, 0  ;;  %p170_p2 = scmp.eq.s32.totalorder %s1330_s25, 1 }
   0x9   : > { %p175_p3 = scmp.ne.s32.totalorder %s1247_s22, %s1243_s21  ;;  %p176_p4 = scmp.eq.s32.totalorder %s1004_s26, 1 }
   0xa   : > { %s1345_s30 = scalar_select %p157_p1, %s1251_s23, %s159_s28  }
   0xb   : > { %p1347_p5 = por %p170_p2, %p169_p0  ;;  %p1351_p6 = por %p176_p4, %p175_p3 }
   0xc   : > { %p1005_p7 = scmp.ge.s32.totalorder %s1255_s24, 1  ;;  %p183_p8 = scmp.lt.s32.totalorder %s1255_s24, 3 }
   0xd   : > { %s1669_s7 = scalar_select %p1347_p5, 1, 0 }
   0xe   : > { %s1670_s8 = scalar_select %p1351_p6, 1, 0 }
   0xf   : > { %p1666_p9 = scmp.eq.s32.totalorder %s1330_s25, 0  ;;  %p1358_p10 = pnand %p1005_p7, %p183_p8 }
  0x10   : > { %s1257_s10 = smov [#allocation4]   ;;  %s1258_s13 = smov [#allocation7]  }
  0x11   : > { %s1671_s9 = scalar_select %p1358_p10, 1, 0 }
  0x12   : > { %s195_s11 = sshll.u32 %s1257_s10, 4  ;;  %p1063_p11 = pneg %p1358_p10  ;;  %s196_s11 = int_to_ptr.vmem [resolvable:$true] %s195_s11 }
  0x13   : > { %s208_s14 = sshll.u32 %s1258_s13, 4  ;;  %s1129_s17 = scalar_lea.hbm %s1660_s1, 512  ;;  %s1370_s14 = int_to_ptr.vmem [resolvable:$true] %s208_s14 }
  0x14   : > { %p1366_p12 = pnand %p1666_p9, %p1063_p11  ;;  %p1130_p13 = scmp.ne.s32.totalorder %s1660_s1, %s1129_s17 }
  0x15   : > { %p1136_p3 = scmp.lt.u32.totalorder %s1129_s17, %s1660_s1 }
  0x16   : > { %p1131_p0 = pneg %p1366_p12 }
  0x18   : > { %p1132_p1 = pnand %p1131_p0, %p1130_p13 }
  0x1a   : > { %p1133_p2 = pneg %p1132_p1 }
  0x1c   : > { %p1138_p4 = pnand %p1136_p3, %p1133_p2 }
  0x1e   : > { %1141 = shalt.err (!%p1138_p4)
}
  0x1f   : > { %s1142_s28 = scalar_lea.vmem %s196_s11, 512  ;;  %p1150_p9 = scmp.lt.s32.totalorder %s196_s11, %s196_s11 }
  0x20   : > { %p1143_p7 = scmp.ne.s32.totalorder %s196_s11, %s1142_s28  ;;  %p1151_p6 = scmp.lt.s32.totalorder %s1142_s28, %s1142_s28 }
  0x22   : > { %p1145_p8 = pnand %p1143_p7, %p1131_p0  ;;  %p1152_p5 = por %p1151_p6, %p1150_p9 }
  0x24   : > { %p1146_p11 = pneg %p1145_p8 }
  0x26   : > { %p1153_p10 = pnand %p1152_p5, %p1146_p11 }
  0x28   : > { %1156 = shalt.err (!%p1153_p10)
}
  0x29   : > { %s1259_s29 = smov 256   ;;  %s1260_s10 = smov 16  }
  0x2a   : > { %1066 = dma.hbm_to_vmem [thread:$0]  (!%p1366_p12), %s1660_s1, 512, %s196_s11, [#allocation5], %s1259_s29, %s1259_s29, %s1260_s10  }
  0x2b   : > { %s1157_s18 = scalar_lea.hbm %s1661_s2, 256 }
  0x2c   : > { %p1158_p13 = scmp.ne.s32.totalorder %s1661_s2, %s1157_s18  ;;  %p1164_p9 = scmp.lt.u32.totalorder %s1157_s18, %s1661_s2 }
  0x2e   : > { %p1160_p5 = pnand %p1158_p13, %p1131_p0 }
  0x30   : > { %p1161_p6 = pneg %p1160_p5 }
  0x32   : > { %p1166_p10 = pnand %p1164_p9, %p1161_p6 }
  0x34   : > { %1169 = shalt.err (!%p1166_p10)
}
  0x35   : > { %s1170_s11 = scalar_lea.vmem %s1370_s14, 256  ;;  %p1178_p4 = scmp.lt.s32.totalorder %s1370_s14, %s1370_s14 }
  0x36   : > { %p1171_p1 = scmp.ne.s32.totalorder %s1370_s14, %s1170_s11  ;;  %p1179_p7 = scmp.lt.s32.totalorder %s1170_s11, %s1170_s11 }
  0x38   : > { %p1173_p2 = pnand %p1171_p1, %p1131_p0  ;;  %p1180_p8 = por %p1179_p7, %p1178_p4 }
  0x3a   : > { %p1174_p3 = pneg %p1173_p2 }
  0x3c   : > { %p1181_p11 = pnand %p1180_p8, %p1174_p3 }
  0x3e   : > { %1184 = shalt.err (!%p1181_p11)
}
  0x3f   : > { %s1261_s29 = smov 128   ;;  %s1262_s10 = smov 8  }
  0x40   : > { %1069 = dma.hbm_to_vmem [thread:$0]  (!%p1366_p12), %s1661_s2, 256, %s1370_s14, [#allocation8], %s1261_s29, %s1261_s29, %s1262_s10  }
  0x41   : > { %p1673_p13 = scmp.ne.s32.totalorder %s1671_s9, 0 }
  0x42   : > { %p1674_p0 = scmp.eq.s32.totalorder (!%p1673_p13), %s1330_s25, 0 }
  0x43   : > { %241 = sbr.rel (%p1673_p13) target bundleno = 848 (0x350), region = 44 }
  0x4a   : > { %1230 = dma.done.wait (%p1674_p0), [#allocation5], 512   ;;  %p1675_p5 = pmov %p1674_p0 }
  0x4b   : > { %p1676_p6 = pmov %p1674_p0 }
  0x4c   : > { %1232 = vsyncadd (%p1675_p5), [#allocation5], 4294966784 }
  0x4d   : > { %1234 = dma.done.wait (%p1676_p6), [#allocation8], 256   ;;  %p1677_p9 = pmov %p1674_p0 }
  0x4e   : > { %p275_p10 = scmp.lt.s32.totalorder %s1330_s25, 1  ;;  %s1263_s18 = smov 1   ;;  %v1271_v2 = vmov 0.0   ;;  %v606_v3 = vld [vmem:[%s1662_s3] sm:$0xff]  ;;  %v1272_v4 = vmov 0   ;;  %v288_v5 = vlaneseq  ;;  %vm522_vm8 = vcmask 1043456  }
  0x4f   : > { %1236 = vsyncadd (%p1677_p9), [#allocation8], 4294967040  ;;  %s1264_s19 = smov 16   ;;  %s1265_s20 = smov 17   ;;  %593 = vmatprep.mubr.f32.mxu1 %v1271_v2  ;;  %885 = vmatprep.mubr.f32.mxu0 %v1271_v2  ;;  %vm515_vm9 = vcmask 293888   ;;  %vm817_vm12 = vcmask 588800  }
  0x50   : > { %s276_s12 = scalar_select %p275_p10, %s1330_s25, 1  ;;  %1127 = vset.pattern.permute.xlu0 %v1272_v4  ;;  %v296_v6 = vshrl.u32 %v288_v5, 7  ;;  %v1455_v7 = vand.u32 127, %v288_v5  ;;  %v371_v10 = vld [vmem:[#allocation4 + $0x3] ss:$8 sm:$0x3] }
  0x51   : > { %s1266_s26 = smov 15   ;;  %s1267_s28 = smov 127   ;;  %v293_v15 = vld [vmem:[#allocation4] ss:$8 sm:$0x3] }
  0x52   : > { %s1025_s14 = sshll.u32 %s276_s12, 3  ;;  %s1268_s11 = smov 112   ;;  %v1457_v8 = vsub.s32 0, %v296_v6  ;;  %v1459_v9 = vsub.s32 1, %v296_v6  ;;  %vm367_vm0 = vcmp.lt.s32.totalorder %v1455_v7, 1  ;;  %vm290_vm1 = vcmp.lt.s32.totalorder %v1455_v7, 17 }
  0x53   : > { %s279_s17 = scalar_lea.vmem %s1659_s0, %s1025_s14  ;;  %s1269_s29 = smov 113   ;;  %v317_v16 = vld [vmem:[#allocation4 + $0x1] ss:$8 sm:$0x3]  ;;  %vm313_vm2 = vcmp.lt.s32.totalorder %v1455_v7, 16  ;;  %vm343_vm3 = vcmp.lt.s32.totalorder %v1455_v7, 15 }
  0x54   : > { %v280_v0 = vld [vmem:[%s279_s17] sm:$0xff]  ;;  %s1270_s10 = smov 111   ;;  %v376_v13 = vrot.slane %v371_v10, %v1457_v8  ;;  %v380_v14 = vrot.slane %v371_v10, %v1459_v9  ;;  %v298_v21 = vrot.slane %v293_v15, %v1457_v8  ;;  %v302_v22 = vrot.slane %v293_v15, %v1459_v9  ;;  %v347_v23 = vld [vmem:[#allocation4 + $0x2] ss:$8 sm:$0x3]  ;;  %s272_s17 = sand.u32 1, %s1247_s22  }
  0x55   : > { %363 = vrot.lane.b32.xlu1 %v280_v0, %s1263_s18  ;;  %393 = vst [vmem:[#allocation2 + $0x20] sm:$0xf] %v280_v0  ;;  %309 = vrot.lane.b32.xlu0 %v280_v0, %s1264_s19  ;;  %v282_v1 = vcombine.high %v280_v0, %v280_v0  ;;  %v322_v26 = vrot.slane %v317_v16, %v1457_v8  ;;  %v403_v42 = vld [vmem:[#allocation4 + $0x5] ss:$8 sm:$0x3]  ;;  %vm399_vm4 = vcmp.lt.s32.totalorder %v1455_v7, 127 }
  0x56   : > { %v326_v27 = vrot.slane %v317_v16, %v1459_v9  ;;  %v352_v32 = vrot.slane %v347_v23, %v1457_v8  ;;  %v356_v33 = vrot.slane %v347_v23, %v1459_v9  ;;  %v408_v51 = vrot.slane %v403_v42, %v1457_v8  ;;  %v457_v53 = vld [vmem:[#allocation4 + $0x7] ss:$8 sm:$0x3]  ;;  %v433_v62 = vld [vmem:[#allocation4 + $0x6] ss:$8 sm:$0x3] }
  0x57   : > { %394 = vst [vmem:[#allocation2 + $0x28] sm:$0xf] %v282_v1  ;;  %v412_v52 = vrot.slane %v403_v42, %v1459_v9  ;;  %vm453_vm5 = vcmp.lt.s32.totalorder %v1455_v7, 112  ;;  %v462_v60 = vrot.slane %v457_v53, %v1457_v8  ;;  %v466_v61 = vrot.slane %v457_v53, %v1459_v9  ;;  %p1678_p1 = scmp.ne.s32.totalorder %s1669_s7, 0  ;;  %s1273_s13 = smov [#allocation9]  }
  0x58   : > { %vm429_vm6 = vcmp.lt.s32.totalorder %v1455_v7, 113  ;;  %vm483_vm7 = vcmp.lt.s32.totalorder %v1455_v7, 111  ;;  %s1189_s15 = sshll.u32 %s1273_s13, 4  ;;  %s1190_s15 = int_to_ptr.vmem [resolvable:$false] %s1189_s15 }
  0x59   : > { %284 = vrot.lane.b32.xlu0 %v280_v0, %s1265_s20  ;;  %365 = vrot.lane.b32.xlu1 %v282_v1, %s1263_s18  ;;  %s1191_s12 = scalar_lea.vmem %s1190_s15, 512 }
  0x5d   : > { %286 = vrot.lane.b32.xlu1 %v282_v1, %s1265_s20  ;;  %311 = vrot.lane.b32.xlu0 %v282_v1, %s1264_s19 }
  0x61   : > { %341 = vrot.lane.b32.xlu1 %v282_v1, %s1266_s26  ;;  %339 = vrot.lane.b32.xlu0 %v280_v0, %s1266_s26 }
  0x65   : > { %397 = vrot.lane.b32.xlu1 %v282_v1, %s1267_s28  ;;  %395 = vrot.lane.b32.xlu0 %v280_v0, %s1267_s28 }
  0x69   : > { %451 = vrot.lane.b32.xlu1 %v282_v1, %s1268_s11  ;;  %449 = vrot.lane.b32.xlu0 %v280_v0, %s1268_s11 }
  0x6d   : > { %427 = vrot.lane.b32.xlu1 %v282_v1, %s1269_s29  ;;  %425 = vrot.lane.b32.xlu0 %v280_v0, %s1269_s29 }
  0x71   : > { %481 = vrot.lane.b32.xlu1 %v282_v1, %s1270_s10  ;;  %479 = vrot.lane.b32.xlu0 %v280_v0, %s1270_s10 }
  0x75   : > { %609 = vperm.xlu0 %1127, %v606_v3  }
  0xc7   : > { %v364_v11 = vpop.permute.xlu1 %363  ;;  %v310_v12 = vpop.permute.xlu0 %309 }
  0xcb   : > { %v285_v17 = vpop.permute.xlu0 %284  ;;  %v366_v18 = vpop.permute.xlu1 %365 }
  0xcc   : > { %v368_v19 = vsel %vm367_vm0, %v364_v11, %v366_v18  ;;  %v369_v20 = vsel %vm367_vm0, %v366_v18, %v364_v11  ;;  %v438_v11 = vrot.slane %v433_v62, %v1457_v8 }
  0xcd   : > { %v383_v24 = vmul.f32 %v376_v13, %v369_v20  ;;  %v384_v25 = vmul.f32 %v380_v14, %v368_v19  ;;  %v487_v14 = vld [vmem:[#allocation4 + $0x10] ss:$8 sm:$0x3] }
  0xcf   : > { %v387_v28 = vrot.slane %v383_v24, 4  ;;  %v388_v29 = vrot.slane %v384_v25, 4  ;;  %v287_v30 = vpop.permute.xlu1 %286  ;;  %v312_v31 = vpop.permute.xlu0 %311 }
  0xd0   : > { %v291_v34 = vsel %vm290_vm1, %v285_v17, %v287_v30  ;;  %v292_v35 = vsel %vm290_vm1, %v287_v30, %v285_v17  ;;  %v314_v36 = vsel %vm313_vm2, %v310_v12, %v312_v31  ;;  %v315_v37 = vsel %vm313_vm2, %v312_v31, %v310_v12 }
  0xd1   : > { %391 = vst [vmem:[#allocation2 + $0x10] sm:$0xf0] %v387_v28  ;;  %392 = vst [vmem:[#allocation2 + $0x18] sm:$0xf0] %v388_v29  ;;  %v305_v38 = vmul.f32 %v298_v21, %v292_v35  ;;  %v306_v39 = vmul.f32 %v302_v22, %v291_v34  ;;  %v329_v40 = vmul.f32 %v322_v26, %v315_v37 }
  0xd2   : > { %v330_v41 = vmul.f32 %v326_v27, %v314_v36  ;;  %v442_v12 = vrot.slane %v433_v62, %v1459_v9  ;;  %v492_v28 = vrot.slane %v487_v14, %v1457_v8  ;;  %v496_v29 = vrot.slane %v487_v14, %v1459_v9 }
  0xd3   : > { %307 = vst [vmem:[#allocation2] sm:$0xf] %v305_v38  ;;  %308 = vst [vmem:[#allocation2 + $0x8] sm:$0xf] %v306_v39  ;;  %v333_v43 = vrot.slane %v329_v40, 4  ;;  %v342_v45 = vpop.permute.xlu1 %341  ;;  %v340_v46 = vpop.permute.xlu0 %339 }
  0xd4   : > { %v334_v44 = vrot.slane %v330_v41, 4  ;;  %v344_v47 = vsel %vm343_vm3, %v340_v46, %v342_v45  ;;  %v345_v48 = vsel %vm343_vm3, %v342_v45, %v340_v46 }
  0xd5   : > { %337 = vst [vmem:[#allocation2] sm:$0xf0] %v333_v43  ;;  %v359_v49 = vmul.f32 %v352_v32, %v345_v48  ;;  %v360_v50 = vmul.f32 %v356_v33, %v344_v47 }
  0xd6   : > { %338 = vst [vmem:[#allocation2 + $0x8] sm:$0xf0] %v334_v44  ;;  %v503_v44 = vld [vmem:[#allocation7] sm:$0xff] }
  0xd7   : > { %361 = vst [vmem:[#allocation2 + $0x10] sm:$0xf] %v359_v49  ;;  %362 = vst [vmem:[#allocation2 + $0x18] sm:$0xf] %v360_v50  ;;  %v398_v54 = vpop.permute.xlu1 %397  ;;  %v396_v55 = vpop.permute.xlu0 %395 }
  0xd8   : > { %v400_v56 = vsel %vm399_vm4, %v396_v55, %v398_v54  ;;  %v401_v57 = vsel %vm399_vm4, %v398_v54, %v396_v55  ;;  %v892_v54 = vld [vmem:[%s1664_s5] sm:$0xff] }
  0xd9   : > { %v415_v58 = vmul.f32 %v408_v51, %v400_v56  ;;  %v416_v59 = vmul.f32 %v412_v52, %v401_v57  ;;  %v626_v57 = vld [vmem:[#allocation4] ss:$8 sm:$0x3] }
  0xdb   : > { %v419_v63 = vrot.slane %v415_v58, 4  ;;  %v420_v0 = vrot.slane %v416_v59, 4  ;;  %v452_v1 = vpop.permute.xlu1 %451  ;;  %v450_v3 = vpop.permute.xlu0 %449  ;;  %v648_v58 = vld [vmem:[#allocation4 + $0x1] ss:$8 sm:$0x3] }
  0xdc   : > { %v454_v4 = vsel %vm453_vm5, %v450_v3, %v452_v1  ;;  %v455_v5 = vsel %vm453_vm5, %v452_v1, %v450_v3  ;;  %v505_v16 = vld [vmem:[#allocation2] sm:$0xff]  ;;  %v653_v62 = vrot.slane %v648_v58, %v1457_v8 }
  0xdd   : > { %423 = vst [vmem:[#allocation2 + $0x20] sm:$0xf0] %v419_v63  ;;  %424 = vst [vmem:[#allocation2 + $0x28] sm:$0xf0] %v420_v0  ;;  %v469_v6 = vmul.f32 %v462_v60, %v454_v4  ;;  %v470_v10 = vmul.f32 %v466_v61, %v455_v5  ;;  %v506_v13 = vld [vmem:[#allocation2 + $0x8] sm:$0xff]  ;;  %v631_v61 = vrot.slane %v626_v57, %v1457_v8 }
  0xde   : > { %v508_v15 = vld [vmem:[#allocation2 + $0x18] sm:$0xff]  ;;  %v507_v17 = vld [vmem:[#allocation2 + $0x10] sm:$0xff]  ;;  %v635_v63 = vrot.slane %v626_v57, %v1459_v9  ;;  %v657_v0 = vrot.slane %v648_v58, %v1459_v9 }
  0xdf   : > { %v473_v18 = vrot.slane %v469_v6, 4  ;;  %v474_v19 = vrot.slane %v470_v10, 4  ;;  %v428_v20 = vpop.permute.xlu1 %427  ;;  %v426_v21 = vpop.permute.xlu0 %425  ;;  %v1027_v22 = vpack.c.bf16 %v508_v15, %v506_v13  ;;  %v1029_v23 = vpack.c.bf16 %v507_v17, %v505_v16  ;;  %v670_v15 = vld [vmem:[#allocation4 + $0x2] ss:$8 sm:$0x3] }
  0xe0   : > { %v430_v24 = vsel %vm429_vm6, %v426_v21, %v428_v20  ;;  %v431_v25 = vsel %vm429_vm6, %v428_v20, %v426_v21  ;;  %v692_v16 = vld [vmem:[#allocation4 + $0x3] ss:$8 sm:$0x3]  ;;  %v675_v21 = vrot.slane %v670_v15, %v1457_v8 }
  0xe1   : > { %477 = vst [vmem:[#allocation2 + $0x30] sm:$0xf0] %v473_v18  ;;  %478 = vst [vmem:[#allocation2 + $0x38] sm:$0xf0] %v474_v19  ;;  %v445_v26 = vmul.f32 %v438_v11, %v430_v24  ;;  %v446_v27 = vmul.f32 %v442_v12, %v431_v25  ;;  %1028 = vmatprep.subr.bf16.mxu1 %v1027_v22  ;;  %v679_v22 = vrot.slane %v670_v15, %v1459_v9 }
  0xe2   : > { %1030 = vmatpush1.bf16.msra.mxu1 %v1029_v23  ;;  %v697_v23 = vrot.slane %v692_v16, %v1457_v8  ;;  %v701_v24 = vrot.slane %v692_v16, %v1459_v9  ;;  %v716_v25 = vld [vmem:[#allocation4 + $0x5] ss:$8 sm:$0x3] }
  0xe3   : > { %447 = vst [vmem:[#allocation2 + $0x30] sm:$0xf] %v445_v26  ;;  %448 = vst [vmem:[#allocation2 + $0x38] sm:$0xf] %v446_v27  ;;  %v482_v30 = vpop.permute.xlu1 %481  ;;  %v480_v31 = vpop.permute.xlu0 %479 }
  0xe4   : > { %v484_v32 = vsel %vm483_vm7, %v480_v31, %v482_v30  ;;  %v485_v33 = vsel %vm483_vm7, %v482_v30, %v480_v31  ;;  %v510_v36 = vld [vmem:[#allocation2 + $0x28] sm:$0xff]  ;;  %v509_v38 = vld [vmem:[#allocation2 + $0x20] sm:$0xff]  ;;  %v721_v31 = vrot.slane %v716_v25, %v1457_v8 }
  0xe5   : > { %v499_v34 = vmul.f32 %v492_v28, %v484_v32  ;;  %v500_v35 = vmul.f32 %v496_v29, %v485_v33  ;;  %v725_v32 = vrot.slane %v716_v25, %v1459_v9 }
  0xe7   : > { %501 = vst [vmem:[#allocation2 + $0x40] sm:$0xf] %v499_v34  ;;  %502 = vst [vmem:[#allocation2 + $0x48] sm:$0xf] %v500_v35 }
  0xea   : > { %v512_v37 = vld [vmem:[#allocation2 + $0x38] sm:$0xff]  ;;  %v511_v39 = vld [vmem:[#allocation2 + $0x30] sm:$0xff] }
  0xeb   : > { %v1031_v40 = vpack.c.bf16 %v512_v37, %v510_v36  ;;  %v1033_v41 = vpack.c.bf16 %v511_v39, %v509_v38 }
  0xed   : > { %1032 = vmatprep.subr.bf16.mxu1 %v1031_v40 }
  0xee   : > { %1034 = vmatpush1.bf16.msra.mxu1 %v1033_v41  ;;  %v514_v42 = vld [vmem:[#allocation2 + $0x48] sm:$0xf]  ;;  %v513_v43 = vld [vmem:[#allocation2 + $0x40] sm:$0xf] }
  0xef   : > { %1015 = vmatprep.subr.msk.mxu1 %vm522_vm8, %v514_v42 }
  0xf2   : > { %1016 = vmatpush1.msk.msra.mxu1 %vm522_vm8, %v513_v43 }
  0xf3   : > { %1017 = vmatmul.mubr.msk.f32.vlgmr.msra.gmra.mrb[0].mxu1 %vm515_vm9, %v503_v44 }
  0xf4   : > { %599 = vmatprep.mubr.f32.mxu1 %v1271_v2  ;;  %v610_v45 = vpop.permute.xlu0 %609  ;;  %v504_v2 = vld [vmem:[#allocation7 + $0x8] sm:$0xff] }
  0xf7   : > { %1018 = vmatmul.mubr.msk.f32.gmra.mrb[2].mxu1 %vm515_vm9, %v504_v2 }
 0x1c6   : > { %v595_v46 = vpop.f32.mrb[0].mxu1 }
 0x1c7   : > { %v612_v47 = vadd.f32 %v610_v45, %v595_v46  ;;  %v597_v48 = vpop.f32.mrb[1].mxu1  ;;  %v760_v46 = vld [vmem:[#allocation4 + $0x7] ss:$8 sm:$0x3] }
 0x1c8   : > { %v613_v49 = vadd.f32 %v610_v45, %v597_v48  ;;  %v738_v45 = vld [vmem:[#allocation4 + $0x6] ss:$8 sm:$0x3] }
 0x1c9   : > { %vm614_vm10 = vcmp.ge.f32.partialorder %v612_v47, 0.0  ;;  %v616_v50 = vmul.f32 0.1, %v612_v47  ;;  %v747_v2 = vrot.slane %v738_v45, %v1459_v9 }
 0x1ca   : > { %v617_v52 = vmul.f32 0.1, %v613_v49  ;;  %vm615_vm11 = vcmp.ge.f32.partialorder %v613_v49, 0.0 }
 0x1cb   : > { %v1519_v51 = vsel %vm614_vm10, %v612_v47, %v616_v50 }
 0x1cc   : > { %642 = vrot.lane.b32.xlu0 %v1519_v51, %s1264_s19  ;;  %620 = vrot.lane.b32.xlu1 %v1519_v51, %s1265_s20  ;;  %v1525_v53 = vsel %vm615_vm11, %v613_v49, %v617_v52  ;;  %v743_v52 = vrot.slane %v738_v45, %v1457_v8 }
 0x1d0   : > { %664 = vrot.lane.b32.xlu0 %v1519_v51, %s1266_s26  ;;  %622 = vrot.lane.b32.xlu1 %v1525_v53, %s1265_s20 }
 0x1d4   : > { %686 = vrot.lane.b32.xlu0 %v1519_v51, %s1263_s18  ;;  %644 = vrot.lane.b32.xlu1 %v1525_v53, %s1264_s19  ;;  %s1026_s19 = sshll.u32 %s1330_s25, 8  ;;  %s909_s25 = scalar_lea.sflag [#allocation6], %s272_s17 }
 0x1d8   : > { %710 = vrot.lane.b32.xlu0 %v1519_v51, %s1267_s28  ;;  %666 = vrot.lane.b32.xlu1 %v1525_v53, %s1266_s26 }
 0x1dc   : > { %732 = vrot.lane.b32.xlu0 %v1519_v51, %s1269_s29  ;;  %688 = vrot.lane.b32.xlu1 %v1525_v53, %s1263_s18  ;;  %s1012_s18 = sshll.u32 %s272_s17, 4 }
 0x1dd   : > { %s274_s20 = scalar_lea.vmem [#allocation9], %s1012_s18 }
 0x1de   : > { %s923_s26 = sshll.u32 %s274_s20, 4  ;;  %s1619_s26 = int_to_ptr.vmem [resolvable:$true] %s923_s26 }
 0x1df   : > { %p1192_p4 = scmp.lt.s32.totalorder %s1619_s26, %s1190_s15 }
 0x1e0   : > { %754 = vrot.lane.b32.xlu0 %v1519_v51, %s1268_s11  ;;  %712 = vrot.lane.b32.xlu1 %v1525_v53, %s1267_s28 }
 0x1e4   : > { %776 = vrot.lane.b32.xlu0 %v1519_v51, %s1270_s10  ;;  %734 = vrot.lane.b32.xlu1 %v1525_v53, %s1269_s29  ;;  %s1617_s29 = scalar_lea.hbm %s1665_s6, %s1026_s19 }
 0x1e8   : > { %895 = vperm.xlu0 %1127, %v892_v54   ;;  %756 = vrot.lane.b32.xlu1 %v1525_v53, %s1268_s11  ;;  %v765_v54 = vrot.slane %v760_v46, %v1457_v8 }
 0x1ec   : > { %778 = vrot.lane.b32.xlu1 %v1525_v53, %s1270_s10  ;;  %s1185_s10 = scalar_lea.vmem %s1619_s26, 256 }
 0x1ed   : > { %p1186_p12 = scmp.ne.s32.totalorder %s1619_s26, %s1185_s10  ;;  %p1193_p7 = scmp.lt.s32.totalorder %s1191_s12, %s1185_s10 }
 0x1ef   : > { %p1187_p2 = pnand %p1186_p12, %p1678_p1  ;;  %p1194_p8 = por %p1193_p7, %p1192_p4 }
 0x1f1   : > { %p1188_p3 = pneg %p1187_p2 }
 0x1f3   : > { %p1195_p11 = pnand %p1194_p8, %p1188_p3 }
 0x23e   : > { %v643_v55 = vpop.permute.xlu0 %642  ;;  %v621_v56 = vpop.permute.xlu1 %620 }
 0x242   : > { %v665_v59 = vpop.permute.xlu0 %664  ;;  %v623_v60 = vpop.permute.xlu1 %622 }
 0x243   : > { %v624_v1 = vsel %vm290_vm1, %v621_v56, %v623_v60  ;;  %v625_v3 = vsel %vm290_vm1, %v623_v60, %v621_v56  ;;  %v782_v56 = vld [vmem:[#allocation4 + $0x10] ss:$8 sm:$0x3] }
 0x244   : > { %v638_v11 = vmul.f32 %v631_v61, %v625_v3  ;;  %v639_v13 = vmul.f32 %v635_v63, %v624_v1  ;;  %v791_v60 = vrot.slane %v782_v56, %v1459_v9 }
 0x246   : > { %v687_v4 = vpop.permute.xlu0 %686  ;;  %v645_v5 = vpop.permute.xlu1 %644 }
 0x247   : > { %v646_v6 = vsel %vm313_vm2, %v643_v55, %v645_v5  ;;  %v647_v10 = vsel %vm313_vm2, %v645_v5, %v643_v55  ;;  %v769_v55 = vrot.slane %v760_v46, %v1459_v9 }
 0x248   : > { %v660_v12 = vmul.f32 %v653_v62, %v647_v10  ;;  %v661_v14 = vmul.f32 %v657_v0, %v646_v6  ;;  %v787_v6 = vrot.slane %v782_v56, %v1457_v8  ;;  %v601_v8 = vpop.f32.mrb[2].mxu1 }
 0x24a   : > { %v667_v17 = vpop.permute.xlu1 %666  ;;  %v1035_v18 = vpack.c.bf16 %v661_v14, %v639_v13  ;;  %v1037_v19 = vpack.c.bf16 %v660_v12, %v638_v11  ;;  %v711_v20 = vpop.permute.xlu0 %710  ;;  %v798_v13 = vld [vmem:[%s1663_s4] sm:$0xff] }
 0x24b   : > { %v668_v26 = vsel %vm343_vm3, %v665_v59, %v667_v17  ;;  %v669_v27 = vsel %vm343_vm3, %v667_v17, %v665_v59  ;;  %v603_v14 = vpop.f32.mrb[3].mxu1 }
 0x24c   : > { %1036 = vmatprep.subr.bf16.mxu0 %v1035_v18  ;;  %v682_v33 = vmul.f32 %v675_v21, %v669_v27  ;;  %v683_v34 = vmul.f32 %v679_v22, %v668_v26 }
 0x24d   : > { %1038 = vmatpush1.bf16.msra.mxu0 %v1037_v19 }
 0x24e   : > { %v689_v28 = vpop.permute.xlu1 %688  ;;  %v733_v37 = vpop.permute.xlu0 %732 }
 0x24f   : > { %v690_v29 = vsel %vm367_vm0, %v687_v4, %v689_v28  ;;  %v691_v30 = vsel %vm367_vm0, %v689_v28, %v687_v4 }
 0x250   : > { %v704_v35 = vmul.f32 %v697_v23, %v691_v30  ;;  %v705_v36 = vmul.f32 %v701_v24, %v690_v29 }
 0x252   : > { %v713_v38 = vpop.permute.xlu1 %712  ;;  %v1039_v39 = vpack.c.bf16 %v705_v36, %v683_v34  ;;  %v1041_v40 = vpack.c.bf16 %v704_v35, %v682_v33  ;;  %v755_v50 = vpop.permute.xlu0 %754 }
 0x253   : > { %v714_v41 = vsel %vm399_vm4, %v711_v20, %v713_v38  ;;  %v715_v42 = vsel %vm399_vm4, %v713_v38, %v711_v20 }
 0x254   : > { %v728_v43 = vmul.f32 %v721_v31, %v714_v41  ;;  %v729_v44 = vmul.f32 %v725_v32, %v715_v42  ;;  %1040 = vmatprep.subr.bf16.mxu0 %v1039_v39 }
 0x255   : > { %1042 = vmatpush1.bf16.msra.mxu0 %v1041_v40 }
 0x256   : > { %v735_v47 = vpop.permute.xlu1 %734  ;;  %v1043_v48 = vpack.c.bf16 %v729_v44, %v1525_v53  ;;  %v1045_v49 = vpack.c.bf16 %v728_v43, %v1519_v51  ;;  %v777_v1 = vpop.permute.xlu0 %776 }
 0x257   : > { %v736_v57 = vsel %vm429_vm6, %v733_v37, %v735_v47  ;;  %v737_v58 = vsel %vm429_vm6, %v735_v47, %v733_v37 }
 0x258   : > { %1044 = vmatprep.subr.bf16.mxu0 %v1043_v48  ;;  %v750_v61 = vmul.f32 %v743_v52, %v736_v57  ;;  %v751_v62 = vmul.f32 %v747_v2, %v737_v58 }
 0x259   : > { %1046 = vmatpush1.bf16.msra.mxu0 %v1045_v49 }
 0x25a   : > { %v757_v53 = vpop.permute.xlu1 %756 }
 0x25b   : > { %v758_v51 = vsel %vm453_vm5, %v755_v50, %v757_v53  ;;  %v759_v59 = vsel %vm453_vm5, %v757_v53, %v755_v50 }
 0x25c   : > { %v772_v63 = vmul.f32 %v765_v54, %v758_v51  ;;  %v773_v0 = vmul.f32 %v769_v55, %v759_v59 }
 0x25e   : > { %v779_v3 = vpop.permute.xlu1 %778  ;;  %v1047_v4 = vpack.c.bf16 %v773_v0, %v751_v62  ;;  %v1049_v5 = vpack.c.bf16 %v772_v63, %v750_v61 }
 0x25f   : > { %v781_v10 = vsel %vm483_vm7, %v779_v3, %v777_v1  ;;  %v780_v11 = vsel %vm483_vm7, %v777_v1, %v779_v3 }
 0x260   : > { %v795_v12 = vmul.f32 %v791_v60, %v781_v10  ;;  %1048 = vmatprep.subr.bf16.mxu0 %v1047_v4  ;;  %v794_v9 = vmul.f32 %v787_v6, %v780_v11 }
 0x261   : > { %1050 = vmatpush1.bf16.msra.mxu0 %v1049_v5 }
 0x262   : > { %837 = vmatprep.subr.mxu0 %v795_v12 }
 0x265   : > { %838 = vmatpush1.msra.mxu0 %v794_v9 }
 0x266   : > { %1019 = vmatmul.mubr.msk.f32.vlgmr.msra.gmra.mrb[0].mxu0 %vm817_vm12, %v798_v13 }
 0x267   : > { %v896_v17 = vpop.permute.xlu0 %895 }
 0x339   : > { %v887_v15 = vpop.f32.mrb[0].mxu0 }
 0x33a   : > { %v888_v7 = vadd.f32 %v887_v15, %v601_v8  ;;  %v889_v16 = vpop.f32.mrb[1].mxu0 }
 0x33b   : > { %v890_v18 = vadd.f32 %v889_v16, %v603_v14 }
 0x33c   : > { %v898_v19 = vadd.f32 %v896_v17, %v888_v7 }
 0x33d   : > { %v899_v20 = vadd.f32 %v896_v17, %v890_v18 }
 0x33e   : > { %vm900_vm13 = vcmp.ge.f32.partialorder %v898_v19, 0.0  ;;  %v902_v21 = vmul.f32 0.1, %v898_v19 }
 0x33f   : > { %vm901_vm14 = vcmp.ge.f32.partialorder %v899_v20, 0.0  ;;  %v903_v22 = vmul.f32 0.1, %v899_v20 }
 0x340   : > { %v904_v23 = vsel %vm900_vm13, %v898_v19, %v902_v21 }
 0x341   : > { %v905_v24 = vsel %vm901_vm14, %v899_v20, %v903_v22  ;;  %906 = vst [vmem:[%s274_s20] sm:$0xff] %v904_v23 }
 0x342   : > { %907 = vst [vmem:[%s274_s20 + $0x8] sm:$0xff] %v905_v24 }
 0x343   : > { %1198 = shalt.err (!%p1195_p11)
}
 0x344   : > { %s1199_s14 = scalar_lea.hbm %s1617_s29, 256  ;;  %s1203_s17 = scalar_lea.hbm %s1665_s6, 512 }
 0x345   : > { %p1200_p13 = scmp.ne.s32.totalorder %s1617_s29, %s1199_s14  ;;  %p1204_p6 = scmp.lt.u32.totalorder %s1617_s29, %s1665_s6 }
 0x346   : > { %p1205_p9 = scmp.lt.u32.totalorder %s1203_s17, %s1199_s14  ;;  %p1207_p12 = scmp.lt.u32.totalorder %s1199_s14, %s1617_s29 }
 0x347   : > { %p1201_p0 = pnand %p1200_p13, %p1678_p1 }
 0x348   : > { %p1206_p10 = por %p1205_p9, %p1204_p6 }
 0x349   : > { %p1202_p5 = pneg %p1201_p0 }
 0x34a   : > { %p1208_p2 = por %p1207_p12, %p1206_p10 }
 0x34c   : > { %p1209_p3 = pnand %p1208_p2, %p1202_p5 }
 0x34e   : > { %1212 = shalt.err (!%p1209_p3)
}
 0x34f   : > { %1061 = dma.vmem_to_hbm [thread:$0]  (%p1678_p1), %s1619_s26, 256, %s1617_s29, %s909_s25  }
 0x350 PF: > { %p1078_p4 = scmp.ge.s32.totalorder %s1255_s24, 2  ;;  %s935_s20 = sand.u32 1, %s1243_s21  }
 0x351   : > { %p1679_p7 = scmp.ne.s32.totalorder %s1670_s8, 0  ;;  %s936_s28 = scalar_lea.sflag [#allocation6], %s935_s20 }
 0x353   : > { %p1071_p8 = pnand %p1078_p4, %p1679_p7 }
 0x355   : > { %1238 = dma.done.wait (!%p1071_p8), %s936_s28, 256  }
 0x356   : > { %1240 = vsyncadd (!%p1071_p8), %s936_s28, 4294967040  ;;  %p18_p11 = scmp.ge.s32.totalorder %s1334_s27, 4   ;;  %s1680_s21 = smov %s1247_s22 }
 0x357   : > { %s1681_s22 = smov %s1251_s23  ;;  %s1682_s23 = smov %s1345_s30 }
 0x358   : > { %s1683_s24 = smov %s1334_s27  ;;  %20 = sbr.rel (!%p18_p11) target bundleno = 5 (0x5), region = 95 }
 0x35f   :  { %941 = vsyncpa [#allocation5], 1 }
 0x360   :  { %943 = vsyncpa [#allocation5 + $0x1], 1 }
 0x361   :  { %944 = vsyncpa [#allocation8], 1 }
 0x362   :  { %945 = vsyncpa [#allocation6], 1 }
 0x363   :  { %947 = vsyncpa [#allocation6 + $0x1], 1 }

</bundles_post_ra>
